<compile_context>
chip_gen: v5e
topology: v5e:2x2
jax: 0.10.0
libtpu: 0.0.40
codegen_flags: <defaults>
</compile_context>

<pallas_src>
import math
from functools import partial

import jax
import jax.numpy as jnp
import numpy as np
from jax import lax
from jax.experimental import pallas as pl
from jax.experimental.pallas import tpu as pltpu

# --- per-generation tuning knobs -------------------------------------------
# v5e/v6e (128 MiB VMEM) can raise row/seq tiles to 1024 and the limit to
# ~96 MiB; keep 512 / 48 MiB on v7x (64 MiB VMEM, 2 TCs).
_VMEM_LIMIT_BYTES = 48 * 1024 * 1024
_MAX_ROW_TILE = 512     # multiple of 8
_MAX_SEQ_TILE = 512     # multiple of 8 and 128
_MAX_K_TILE = 1024      # contraction tile for dense_tanh


def _round_up(x, m):
    return ((x + m - 1) // m) * m


def _cparams(dimension_semantics):
    return pltpu.CompilerParams(dimension_semantics=dimension_semantics,
                                vmem_limit_bytes=_VMEM_LIMIT_BYTES)


def _const_spec(shape, index_map):
    """BlockSpec for grid-invariant operands (weights / biases).

    They never change across the grid, so single-buffer them to free VMEM for
    larger data tiles.  Falls back to a default BlockSpec if pipeline_mode is
    not supported by the installed JAX.
    """
    try:
        return pl.BlockSpec(shape, index_map, pipeline_mode=pl.Buffered(1))
    except Exception:   # pragma: no cover - older JAX without pipeline_mode
        return pl.BlockSpec(shape, index_map)


# ----------------------------------------------------------------------------
# Kernel 1: fused  y = tanh(x @ W^T + b)   (nn.Linear + tanh).
# Row-tiled ("parallel") and K-tiled ("arbitrary") with an f32 accumulator.
# W is passed PRE-TRANSPOSED as (H_in, H_out) so there is no in-kernel .T.
# Used by the default (CLS) path, the tagger path and the tokens path.
# ----------------------------------------------------------------------------
def dense_tanh_kernel(x_ref, wt_ref, b_ref, out_ref, acc_ref):
    k = pl.program_id(1)

    @pl.when(k == 0)
    def _init():
        acc_ref[...] = jnp.zeros_like(acc_ref)

    acc_ref[...] += jnp.dot(x_ref[...], wt_ref[...],
                            preferred_element_type=jnp.float32)

    @pl.when(k == pl.num_programs(1) - 1)
    def _finalize():
        out_ref[...] = jnp.tanh(acc_ref[...] + b_ref[...]).astype(out_ref.dtype)


def _k_tile(h_in, max_k):
    if h_in <= max_k:
        return h_in
    for t in (1024, 512, 256, 128):
        if t <= max_k and h_in % t == 0:
            return t
    return h_in   # awkward K (rare): keep whole contraction resident


def dense_tanh(x2d, w_t, b2d, *, out_dtype=None,
               max_rows_per_block=_MAX_ROW_TILE, max_k_block=_MAX_K_TILE):
    n, h_in = x2d.shape
    h_out = w_t.shape[1]
    out_dtype = x2d.dtype if out_dtype is None else out_dtype

    # Bounded row tiles; pad awkward N up to a multiple of the tile instead of
    # falling back to one giant block.
    if n <= max_rows_per_block:
        tm, n_pad = n, n
    else:
        tm = max_rows_per_block
        n_pad = _round_up(n, tm)
        if n_pad != n:
            x2d = jnp.pad(x2d, ((0, n_pad - n), (0, 0)))

    tk = _k_tile(h_in, max_k_block)
    if tk == h_in:     # whole contraction in one step -> W^T is grid-invariant
        w_spec = _const_spec((tk, h_out), lambda i, k: (0, 0))
    else:
        w_spec = pl.BlockSpec((tk, h_out), lambda i, k: (k, 0))

    y = pl.pallas_call(
        dense_tanh_kernel,
        out_shape=jax.ShapeDtypeStruct((n_pad, h_out), out_dtype),
        grid=(n_pad // tm, h_in // tk),
        in_specs=[
            pl.BlockSpec((tm, tk), lambda i, k: (i, k)),    # row/K tile of x
            w_spec,                                         # W^T tile
            _const_spec((1, h_out), lambda i, k: (0, 0)),   # bias (invariant)
        ],
        out_specs=pl.BlockSpec((tm, h_out), lambda i, k: (i, 0)),
        scratch_shapes=[pltpu.VMEM((tm, h_out), jnp.float32)],
        compiler_params=_cparams(("parallel", "arbitrary")),
    )(x2d, w_t, b2d)
    return y if n_pad == n else y[:n]


# ----------------------------------------------------------------------------
# Kernel 2: tokens path — masked mean-pool over the sequence.
# Grid = (batch, seq_tiles); f32 accumulators across seq tiles
# (pl.when init / finalize); the masked sum is an MXU matmul (1, ts) x (ts, H).
# The dense projection is NOT fused here: the pooled (B, H) matrix is fed to
# dense_tanh so the weight is not VMEM-resident during pooling and the dense
# runs as one batched matmul instead of B separate M=1 matmuls.
# ----------------------------------------------------------------------------
def masked_mean_pool_kernel(mask_ref, feat_ref, out_ref, sum_acc, cnt_acc):
    s = pl.program_id(1)

    @pl.when(s == 0)
    def _init():
        sum_acc[...] = jnp.zeros_like(sum_acc)
        cnt_acc[...] = jnp.zeros_like(cnt_acc)

    mask = mask_ref[0]                  # (1, ts)
    feat = feat_ref[0]                  # (ts, H)
    sum_acc[...] += jnp.dot(mask, feat, preferred_element_type=jnp.float32)
    cnt_acc[...] += jnp.sum(mask, axis=1, keepdims=True)

    @pl.when(s == pl.num_programs(1) - 1)
    def _finalize():
        # NOTE: rows with zero <e>-marked tokens divide by zero, matching the
        # PyTorch module's behavior (NaN/Inf propagates).
        inv = pl.reciprocal(cnt_acc[...], approx=False)
        out_ref[0] = (sum_acc[...] * inv).astype(out_ref.dtype)


def masked_mean_pool(features_l, event_tokens, *, max_seq_tile=_MAX_SEQ_TILE):
    bsz, seq, hidden = features_l.shape
    mask = event_tokens.astype(features_l.dtype)

    if seq <= max_seq_tile:
        ts, seq_pad = seq, seq
    else:
        ts = max_seq_tile
        seq_pad = _round_up(seq, ts)
        if seq_pad != seq:              # zero padding is pooling-neutral
            features_l = jnp.pad(features_l,
                                 ((0, 0), (0, seq_pad - seq), (0, 0)))
            mask = jnp.pad(mask, ((0, 0), (0, seq_pad - seq)))
    mask3 = mask.reshape(bsz, 1, seq_pad)

    pooled = pl.pallas_call(
        masked_mean_pool_kernel,
        out_shape=jax.ShapeDtypeStruct((bsz, 1, hidden), features_l.dtype),
        grid=(bsz, seq_pad // ts),
        in_specs=[
            pl.BlockSpec((1, 1, ts), lambda b, s: (b, 0, s)),        # mask tile
            pl.BlockSpec((1, ts, hidden), lambda b, s: (b, s, 0)),   # feat tile
        ],
        out_specs=pl.BlockSpec((1, 1, hidden), lambda b, s: (b, 0, 0)),
        scratch_shapes=[
            pltpu.VMEM((1, hidden), jnp.float32),   # masked-sum accumulator
            pltpu.VMEM((1, 1), jnp.float32),        # token-count accumulator
        ],
        compiler_params=_cparams(("parallel", "arbitrary")),
    )(mask3, features_l)
    return pooled.reshape(bsz, hidden)


# ----------------------------------------------------------------------------
# Kernel 3: relations path.  Grid = (batch, head); per grid step one
# (1, 1, S, S) output block.  q_all / k_all are projected once per batch into
# VMEM scratch (head axis is "arbitrary" so scratch is carried), each head
# then slices a lane-aligned 128-wide strip and runs QK^T on the MXU
# (dot_general contracting last dims, no transpose op).
# ----------------------------------------------------------------------------
def relations_kernel(hs_ref, wqt_ref, bq_ref, wkt_ref, bk_ref, out_ref,
                     q_sc, k_sc, *, head_pad):
    h = pl.program_id(1)

    @pl.when(h == 0)
    def _project():
        hs = hs_ref[0]                                               # (S, H)
        q = jnp.dot(hs, wqt_ref[...],
                    preferred_element_type=jnp.float32) + bq_ref[...]
        k = jnp.dot(hs, wkt_ref[...],
                    preferred_element_type=jnp.float32) + bk_ref[...]
        q_sc[...] = q.astype(q_sc.dtype)
        k_sc[...] = k.astype(k_sc.dtype)

    off = pl.multiple_of(h * head_pad, head_pad)       # lane-aligned head slice
    q_h = q_sc[:, pl.ds(off, head_pad)]                # (S, head_pad)
    k_h = k_sc[:, pl.ds(off, head_pad)]                # (S, head_pad)
    scores = lax.dot_general(q_h, k_h, (((1,), (1,)), ((), ())),
                             preferred_element_type=jnp.float32)     # (S, S)
    out_ref[0, 0] = jnp.tanh(scores).astype(out_ref.dtype)


def _pack_heads(w, b, num_heads, head_size, head_pad, scale, dtype):
    """nn.Linear weight (A, H) -> pre-transposed (H, heads*head_pad) with each
    head zero-padded to a 128-lane boundary, `scale` folded in.  Zero columns
    contribute 0 to QK^T, so results are unchanged."""
    hidden = w.shape[1]
    w3 = (w.astype(jnp.float32) * scale).reshape(num_heads, head_size, hidden)
    w3 = jnp.transpose(w3, (2, 0, 1))                                # (H, nh, hd)
    w3 = jnp.pad(w3, ((0, 0), (0, 0), (0, head_pad - head_size)))
    wt = w3.reshape(hidden, num_heads * head_pad).astype(dtype)
    b2 = (b.astype(jnp.float32) * scale).reshape(num_heads, head_size)
    b2 = jnp.pad(b2, ((0, 0), (0, head_pad - head_size)))
    b2 = b2.reshape(1, num_heads * head_pad).astype(dtype)
    return wt, b2


def relations_scores(hidden_states, wq, bq, wk, bk, num_heads, head_size, *,
                     permute_output=False):
    bsz, seq, hidden = hidden_states.shape
    dtype = hidden_states.dtype
    head_pad = _round_up(head_size, 128)
    packed = num_heads * head_pad
    scale = 1.0 / math.sqrt(head_size)

    # One-time parameter prep (hoist to load-time in a real deployment):
    # pre-transpose, lane-pad each head, fold the 1/sqrt(head_size) score
    # scale into the query projection.
    wqt, bq2 = _pack_heads(wq, bq, num_heads, head_size, head_pad, scale, dtype)
    wkt, bk2 = _pack_heads(wk, bk, num_heads, head_size, head_pad, 1.0, dtype)

    out = pl.pallas_call(
        partial(relations_kernel, head_pad=head_pad),
        out_shape=jax.ShapeDtypeStruct((bsz, num_heads, seq, seq), dtype),
        grid=(bsz, num_heads),
        in_specs=[
            pl.BlockSpec((1, seq, hidden), lambda b, h: (b, 0, 0)),   # features
            _const_spec((hidden, packed), lambda b, h: (0, 0)),       # Wq^T
            _const_spec((1, packed), lambda b, h: (0, 0)),            # bq
            _const_spec((hidden, packed), lambda b, h: (0, 0)),       # Wk^T
            _const_spec((1, packed), lambda b, h: (0, 0)),            # bk
        ],
        out_specs=pl.BlockSpec((1, 1, seq, seq), lambda b, h: (b, h, 0, 0)),
        scratch_shapes=[
            pltpu.VMEM((seq, packed), dtype),   # q_all (reused across heads)
            pltpu.VMEM((seq, packed), dtype),   # k_all
        ],
        compiler_params=_cparams(("parallel", "arbitrary")),
    )(hidden_states, wqt, bq2, wkt, bk2)

    if permute_output:
        # PyTorch contract: (B, S, S, num_heads).  This is a full HBM round
        # trip of the largest tensor; consumers that accept the lane-dense
        # (B, heads, S, S) layout should keep permute_output=False.
        return jnp.transpose(out, (0, 2, 3, 1))
    return out


# ----------------------------------------------------------------------------
# Module-equivalent wrapper
# ----------------------------------------------------------------------------
def representation_projection_forward(features, event_tokens, params, *,
                                      layer_to_use, tokens, tagger, relations,
                                      num_attention_heads, head_size,
                                      relations_permute_output=True):
    # Dropout is identity in eval mode.
    feats_l = features[layer_to_use]                       # (B, S, H)
    bsz, seq, hidden = feats_l.shape
    dtype = feats_l.dtype                                  # bf16 in -> bf16 out

    if relations:
        # dense is nn.Identity() in relations mode; tanh is fused in-kernel.
        return relations_scores(feats_l, params["q_w"], params["q_b"],
                                params["k_w"], params["k_b"],
                                num_attention_heads, head_size,
                                permute_output=relations_permute_output)

    # nn.Linear weight is (H_out, H_in); pre-transpose once in the wrapper so
    # no kernel transposes on the XLU, and keep it in the feature dtype.
    w_t = params["dense_w"].T.astype(dtype)
    b2d = params["dense_b"].reshape(1, -1).astype(dtype)
    h_out = w_t.shape[1]

    if tokens:
        pooled = masked_mean_pool(feats_l, event_tokens)   # (B, H)
        return dense_tanh(pooled, w_t, b2d, out_dtype=dtype)
    elif tagger:
        x2d = feats_l.reshape(bsz * seq, hidden)           # glue reshape
        y = dense_tanh(x2d, w_t, b2d, out_dtype=dtype)
        return y.reshape(bsz, seq, h_out)
    else:
        # TODO(synk): fuse the CLS row selection into the dense BlockSpec once
        # sub-8 sublane blocks are portable; the slice below is a small glue op.
        x_cls = feats_l[:, 0, :]
        return dense_tanh(x_cls, w_t, b2d, out_dtype=dtype)


# ----------------------------------------------------------------------------
# Pure-JAX reference (mirrors the PyTorch forward) for correctness checking
# ----------------------------------------------------------------------------
def reference_forward(features, event_tokens, params, *, layer_to_use, tokens,
                      tagger, relations, num_attention_heads, head_size):
    hp = lax.Precision.HIGHEST
    feats_l = features[layer_to_use]
    bsz, seq, hidden = feats_l.shape
    if tokens:
        counts = event_tokens.sum(1)
        expanded = jnp.broadcast_to(event_tokens[:, :, None], (bsz, seq, hidden))
        x = (feats_l * expanded).sum(1) / counts[:, None]
    elif tagger:
        x = feats_l
    elif relations:
        q = jnp.dot(feats_l, params["q_w"].T, precision=hp) + params["q_b"]
        k = jnp.dot(feats_l, params["k_w"].T, precision=hp) + params["k_b"]
        q = q.reshape(bsz, seq, num_attention_heads, head_size).transpose(0, 2, 1, 3)
        k = k.reshape(bsz, seq, num_attention_heads, head_size).transpose(0, 2, 1, 3)
        scores = jnp.einsum("bhqd,bhkd->bhqk", q, k, precision=hp)
        scores = scores / math.sqrt(head_size)
        x = jnp.transpose(scores, (0, 2, 3, 1))
        return jnp.tanh(x)            # dense is Identity in relations mode
    else:
        x = feats_l[..., 0, :]
    x = jnp.dot(x, params["dense_w"].T, precision=hp) + params["dense_b"]
    return jnp.tanh(x)


if __name__ == "__main__":
    # small, deterministic shapes
    B, S, H = 2, 8, 32
    NUM_HEADS, HEAD_SIZE = 4, 8
    NUM_LAYERS = 3
    LAYER = -1

    key = jax.random.PRNGKey(0)
    keys = jax.random.split(key, 8)

    # synthetic "encoder outputs": tuple of per-layer hidden states (B, S, H)
    features = tuple(
        jax.random.normal(keys[i], (B, S, H), dtype=jnp.float32)
        for i in range(NUM_LAYERS)
    )
    # <e>-marked token mask, at least one marked token per sequence
    event_tokens = jnp.zeros((B, S), dtype=jnp.float32)
    event_tokens = event_tokens.at[0, 1].set(1.0).at[0, 2].set(1.0).at[1, 3].set(1.0)

    # deterministic parameter init (PyTorch nn.Linear-style uniform bounds)
    def linear_init(k, out_f, in_f):
        bound = 1.0 / math.sqrt(in_f)
        kw, kb = jax.random.split(k)
        w = jax.random.uniform(kw, (out_f, in_f), jnp.float32, -bound, bound)
        b = jax.random.uniform(kb, (out_f,), jnp.float32, -bound, bound)
        return w, b

    dense_w, dense_b = linear_init(keys[3], H, H)
    q_w, q_b = linear_init(keys[4], NUM_HEADS * HEAD_SIZE, H)
    k_w, k_b = linear_init(keys[5], NUM_HEADS * HEAD_SIZE, H)
    params = dict(dense_w=dense_w, dense_b=dense_b,
                  q_w=q_w, q_b=q_b, k_w=k_w, k_b=k_b)

    modes = [
        ("cls",       dict(tokens=False, tagger=False, relations=False)),
        ("tokens",    dict(tokens=True,  tagger=False, relations=False)),
        ("tagger",    dict(tokens=False, tagger=True,  relations=False)),
        ("relations", dict(tokens=False, tagger=False, relations=True)),
    ]

    ok = True
    for name, m in modes:
        out = representation_projection_forward(
            features, event_tokens, params,
            layer_to_use=LAYER, num_attention_heads=NUM_HEADS,
            head_size=HEAD_SIZE, **m)
        out = jax.block_until_ready(out)
        ref = reference_forward(
            features, event_tokens, params,
            layer_to_use=LAYER, num_attention_heads=NUM_HEADS,
            head_size=HEAD_SIZE, **m)
        if not np.allclose(np.asarray(out), np.asarray(ref), atol=1e-4, rtol=1e-4):
            ok = False
            print(f"MISMATCH in mode {name}: "
                  f"max abs err = {np.max(np.abs(np.asarray(out) - np.asarray(ref)))}")

    # Lane-dense relations output (recommended fast path, no HBM-roundtrip permute).
    out_ld = relations_scores(features[LAYER], params["q_w"], params["q_b"],
                              params["k_w"], params["k_b"],
                              NUM_HEADS, HEAD_SIZE, permute_output=False)
    out_ld = jax.block_until_ready(out_ld)
    ref_rel = reference_forward(features, event_tokens, params,
                                layer_to_use=LAYER, tokens=False, tagger=False,
                                relations=True, num_attention_heads=NUM_HEADS,
                                head_size=HEAD_SIZE)
    ref_ld = jnp.transpose(ref_rel, (0, 3, 1, 2))
    if not np.allclose(np.asarray(out_ld), np.asarray(ref_ld), atol=1e-4, rtol=1e-4):
        ok = False
        print("MISMATCH in mode relations (lane-dense): "
              f"max abs err = {np.max(np.abs(np.asarray(out_ld) - np.asarray(ref_ld)))}")

    if ok:
        print("KERNEL_OK")
</pallas_src>

<mosaic_0001>
module attributes {stable_mosaic.version = 11 : i64} {
  func.func @dense_tanh_kernel(%arg0: i32, %arg1: i32, %arg2: memref<2x32xf32, #tpu.memory_space<vmem>>, %arg3: memref<32x32xf32, #tpu.memory_space<vmem>>, %arg4: memref<1x32xf32, #tpu.memory_space<vmem>>, %arg5: memref<2x32xf32, #tpu.memory_space<vmem>>, %arg6: memref<2x32xf32, #tpu.memory_space<vmem>>) attributes {dimension_semantics = [#tpu.dimension_semantics<parallel>, #tpu.dimension_semantics<arbitrary>], iteration_bounds = array<i64: 1, 1>, scalar_prefetch = 0 : i64, scratch_operands = 1 : i64, tpu.core_type = #tpu.core_type<tc>, window_params = [{transform_indices = @transform_0, window_bounds = array<i64: 2, 32>}, {pipeline_mode = #tpu.pipeline_mode<synchronous>, transform_indices = @transform_1, window_bounds = array<i64: 32, 32>}, {pipeline_mode = #tpu.pipeline_mode<synchronous>, transform_indices = @transform_2, window_bounds = array<i64: 1, 32>}, {transform_indices = @transform_3, window_bounds = array<i64: 2, 32>}]} {
    %c0_i32 = arith.constant 0 : i32
    %0 = arith.cmpi eq, %arg1, %c0_i32 : i32
    %1 = arith.extui %0 : i1 to i32
    %c0_i32_0 = arith.constant 0 : i32
    %2 = arith.cmpi ne, %1, %c0_i32_0 : i32
    scf.if %2 {
      %cst_10 = arith.constant 0.000000e+00 : f32
      %12 = vector.broadcast %cst_10 : f32 to vector<2x32xf32>
      %c0_11 = arith.constant 0 : index
      %c0_12 = arith.constant 0 : index
      %13 = vector.load %arg6[%c0_11, %c0_12] : memref<2x32xf32, #tpu.memory_space<vmem>>, vector<2x32xf32>
      tpu.vector_store %arg6[%c0_11, %c0_12], %12 {strides = array<i32>} : memref<2x32xf32, #tpu.memory_space<vmem>>, vector<2x32xf32>,
    } else {
    }
    %c0 = arith.constant 0 : index
    %c0_1 = arith.constant 0 : index
    %3 = vector.load %arg6[%c0, %c0_1] : memref<2x32xf32, #tpu.memory_space<vmem>>, vector<2x32xf32>
    %c0_2 = arith.constant 0 : index
    %c0_3 = arith.constant 0 : index
    %4 = vector.load %arg2[%c0_2, %c0_3] : memref<2x32xf32, #tpu.memory_space<vmem>>, vector<2x32xf32>
    %c0_4 = arith.constant 0 : index
    %c0_5 = arith.constant 0 : index
    %5 = vector.load %arg3[%c0_4, %c0_5] : memref<32x32xf32, #tpu.memory_space<vmem>>, vector<32x32xf32>
    %cst = arith.constant dense<0.000000e+00> : vector<2x32xf32>
    %6 = tpu.matmul %4, %5, %cst {dimension_numbers = #tpu.dot_dimension_numbers<[1], [0], [0], [1], [0, 0, 1, 1], [], []>} : vector<2x32xf32>, vector<32x32xf32>, vector<2x32xf32> -> vector<2x32xf32>
    %7 = arith.addf %3, %6 : vector<2x32xf32>
    %c0_6 = arith.constant 0 : index
    %c0_7 = arith.constant 0 : index
    %8 = vector.load %arg6[%c0_6, %c0_7] : memref<2x32xf32, #tpu.memory_space<vmem>>, vector<2x32xf32>
    tpu.vector_store %arg6[%c0_6, %c0_7], %7 {strides = array<i32>} : memref<2x32xf32, #tpu.memory_space<vmem>>, vector<2x32xf32>,
    %c0_i32_8 = arith.constant 0 : i32
    %9 = arith.cmpi eq, %arg1, %c0_i32_8 : i32
    %10 = arith.extui %9 : i1 to i32
    %c0_i32_9 = arith.constant 0 : i32
    %11 = arith.cmpi ne, %10, %c0_i32_9 : i32
    scf.if %11 {
      %c0_10 = arith.constant 0 : index
      %c0_11 = arith.constant 0 : index
      %12 = vector.load %arg6[%c0_10, %c0_11] : memref<2x32xf32, #tpu.memory_space<vmem>>, vector<2x32xf32>
      %c0_12 = arith.constant 0 : index
      %c0_13 = arith.constant 0 : index
      %13 = vector.load %arg4[%c0_12, %c0_13] : memref<1x32xf32, #tpu.memory_space<vmem>>, vector<1x32xf32>
      %14 = vector.broadcast %13 : vector<1x32xf32> to vector<2x32xf32>
      %15 = arith.addf %12, %14 : vector<2x32xf32>
      %16 = math.tanh %15 : vector<2x32xf32>
      %c0_14 = arith.constant 0 : index
      %c0_15 = arith.constant 0 : index
      %17 = vector.load %arg5[%c0_14, %c0_15] : memref<2x32xf32, #tpu.memory_space<vmem>>, vector<2x32xf32>
      tpu.vector_store %arg5[%c0_14, %c0_15], %16 {strides = array<i32>} : memref<2x32xf32, #tpu.memory_space<vmem>>, vector<2x32xf32>,
    } else {
    }
    return
  }
  func.func @transform_0(%arg0: i32, %arg1: i32) -> (i32, i32) {
    %c0_i32 = arith.constant 0 : i32
    return %arg0, %arg1 : i32, i32
  }
  func.func @transform_1(%arg0: i32, %arg1: i32) -> (i32, i32) {
    %c0_i32 = arith.constant 0 : i32
    %c0_i32_0 = arith.constant 0 : i32
    %c0_i32_1 = arith.constant 0 : i32
    return %c0_i32, %c0_i32_0 : i32, i32
  }
  func.func @transform_2(%arg0: i32, %arg1: i32) -> (i32, i32) {
    %c0_i32 = arith.constant 0 : i32
    %c0_i32_0 = arith.constant 0 : i32
    %c0_i32_1 = arith.constant 0 : i32
    return %c0_i32, %c0_i32_0 : i32, i32
  }
  func.func @transform_3(%arg0: i32, %arg1: i32) -> (i32, i32) {
    %c0_i32 = arith.constant 0 : i32
    %c0_i32_0 = arith.constant 0 : i32
    return %arg0, %c0_i32 : i32, i32
  }
}

</mosaic_0001>

<bundles_post_ra>
// kernel: tpu_custom_call.1
= control target key start
LH: loop header
LB: loop body
LE: loop exit
PB: predicated region body
PF: predicated region fallthrough
CT: control target
= control target key end

     0   :  { %8 = vsyncpa [#allocation4], 0  ;;  %s242_s0 = inlined_call_operand.hbm [shape: f32[2,32], index: 0, kind: input, shape index: {}]   ;;  %s243_s1 = inlined_call_operand.hbm [shape: f32[32,32], index: 1, kind: input, shape index: {}]   ;;  %s244_s2 = inlined_call_operand.vmem [shape: f32[1,32], index: 2, kind: input, shape index: {}]   ;;  %s245_s3 = inlined_call_operand.hbm [shape: f32[2,32], index: 3, kind: output, shape index: {}]  }
   0x1   :  { %9 = vsyncpa [#allocation7], 0 }
   0x2   :  { %10 = vsyncpa [#allocation5], 0  ;;  %s16_s14 = sshll.u32 %s242_s0, 4  ;;  %s201_s15 = smov [#allocation3]   ;;  %s17_s14 = int_to_ptr.hbm [resolvable:$true] %s16_s14 }
   0x3   :  { %s18_s16 = sshll.u32 %s201_s15, 4  ;;  %s26_s19 = sshll.u32 %s243_s1, 4  ;;  %s19_s16 = int_to_ptr.vmem [resolvable:$true] %s18_s16  ;;  %s27_s19 = int_to_ptr.hbm [resolvable:$true] %s26_s19 }
   0x4   :  { %21 = dma.hbm_to_vmem [thread:$0]  %s17_s14, 32, %s19_s16, [#allocation4]  }
   0x5   :  { %s202_s20 = smov [#allocation6]   ;;  %s203_s22 = smov 128  }
   0x6   :  { %s28_s21 = sshll.u32 %s202_s20, 4  ;;  %s204_s23 = smov 8   ;;  %s29_s21 = int_to_ptr.vmem [resolvable:$true] %s28_s21 }
   0x7   :  { %34 = dma.hbm_to_vmem [thread:$0]  %s27_s19, 512, %s29_s21, [#allocation7], %s203_s22, %s203_s22, %s204_s23  }
   0x8   :  { %195 = dma.done.wait [#allocation4], 32  }
   0x9   :  { %196 = vsyncadd [#allocation4], 4294967264 }
   0xa   :  { %197 = dma.done.wait [#allocation7], 512  }
   0xb   :  { %198 = vsyncadd [#allocation7], 4294966784  ;;  %vm49_vm0 = vcmask 254976   ;;  %v205_v0 = vmov 0.0   ;;  %v56_v1 = vld [vmem:[#allocation6 + $0x18] sm:$0xff]  ;;  %v55_v2 = vld [vmem:[#allocation6 + $0x10] sm:$0xff] }
   0xc   :  { %50 = vst.msk [vmem:[#allocation2] sm:$0x3] %vm49_vm0, %v205_v0  ;;  %73 = vmatpush.msra.mxu0 %v56_v1  ;;  %v54_v3 = vld [vmem:[#allocation6 + $0x8] sm:$0xff]  ;;  %v53_v4 = vld [vmem:[#allocation6] sm:$0xff]  ;;  %v52_v5 = vld [vmem:[#allocation3] sm:$0x3] }
   0xd   :  { %vm57_vm1 = vcmask 261120   ;;  %v120_v9 = vld [vmem:[%s244_s2] ss:$0 sm:$0xff]  ;;  %s206_s24 = smov [#allocation8]   ;;  %s102_s28 = sshll.u32 %s245_s3, 4  ;;  %s103_s28 = int_to_ptr.hbm [resolvable:$true] %s102_s28 }
   0xe   :  { %74 = vmatpush.msra.mxu0 %v55_v2  ;;  %s100_s25 = sshll.u32 %s206_s24, 4  ;;  %s101_s25 = int_to_ptr.vmem [resolvable:$true] %s100_s25 }
  0x10   :  { %75 = vmatpush.msra.mxu0 %v54_v3 }
  0x12   :  { %76 = vmatpush.msra.mxu0 %v53_v4 }
  0x13   :  { %113 = vmatmul.msk.f32.vlgmr.msra.gmra.mxu0 %vm57_vm1, %v52_v5  ;;  %v51_v6 = vld [vmem:[#allocation2] sm:$0x3] }
  0x90   :  { %v78_v7 = vpop.f32.mrf.mxu0 }
  0x91   :  { %v81_v8 = vadd.f32 %v78_v7, %v51_v6 }
  0x93   :  { %83 = vst.msk [vmem:[#allocation2] sm:$0x3] %vm49_vm0, %v81_v8 }
  0x9a   :  { %v87_v10 = vld [vmem:[#allocation2] sm:$0x3] }
  0x9b   :  { %v92_v11 = vadd.f32 %v120_v9, %v87_v10 }
  0x9d   :  { %121 = vtanh.f32 %v92_v11 }
  0xa3   :  { %v122_v12 = vpop.eup %121 }
  0xa4   :  { %94 = vst.msk [vmem:[#allocation8] sm:$0x3] %vm49_vm0, %v122_v12 }
  0xa5   :  { %105 = dma.vmem_to_hbm [thread:$0]  %s101_s25, 32, %s103_s28, [#allocation5]  }
  0xa6   :  { %199 = dma.done.wait [#allocation5], 32  }
  0xa7   :  { %200 = vsyncadd [#allocation5], 4294967264 }
  0xa8   :  { %110 = vsyncpa [#allocation4], 1 }
  0xa9   :  { %111 = vsyncpa [#allocation7], 1 }
  0xaa   :  { %112 = vsyncpa [#allocation5], 1 }

</bundles_post_ra>
